<compile_context>
chip_gen: v6e
topology: v6e:2x2x1
jax: 0.10.0
libtpu: 0.0.40
codegen_flags: <defaults>
</compile_context>

<pallas_src>
import functools

import jax
import jax.numpy as jnp
from jax import lax
from jax.experimental import pallas as pl
from jax.experimental.pallas import tpu as pltpu

NUM_CLASSES = 19
IGNORE_ID = 19
MAX_TPIX = 32768                  # pixels per grid step (multiple of 128)
VMEM_LIMIT_BYTES = 32 * 1024 * 1024


def _round_up(x, m):
    return ((x + m - 1) // m) * m


def _ce_kernel(logits_ref, labels_ref, sum_ref, cnt_ref, *, ignore_id):
    p = pl.program_id(2)

    @pl.when(p == 0)
    def _():
        sum_ref[...] = jnp.zeros_like(sum_ref)
        cnt_ref[...] = jnp.zeros_like(cnt_ref)

    x = logits_ref[0].astype(jnp.float32)        # (C, T): classes on sublanes
    lab = labels_ref[0].astype(jnp.int32)        # (1, T): pixels on lanes

    # Numerically-stable log-softmax pieces over the class (sublane) axis.
    m = jnp.max(x, axis=0, keepdims=True)                                 # (1,T)
    xm = x - m                                                            # (C,T)
    lse0 = jnp.log(jnp.sum(jnp.exp(xm), axis=0, keepdims=True))           # (1,T)

    # Target-class logit via one-hot select (no dynamic gather on TPU).
    cls = lax.broadcasted_iota(jnp.int32, x.shape, 0)                     # (C,T)
    sel = jnp.sum(jnp.where(cls == lab, xm, 0.0), axis=0, keepdims=True)  # (1,T)

    valid = lab != ignore_id                                              # (1,T)
    nll = jnp.where(valid, lse0 - sel, 0.0)                               # (1,T)

    # Lane-dense per-pixel-slot partial sums; reduced once in the wrapper.
    sum_ref[...] += nll
    cnt_ref[...] += valid.astype(jnp.float32)


def semseg_cross_entropy(logits, labels, num_classes=NUM_CLASSES,
                         ignore_id=IGNORE_ID, max_tpix=MAX_TPIX):
    """logits: [N, C, H, W] (f32 or bf16); labels: [N, H, W] int.

    Returns the scalar mean cross-entropy over non-ignored pixels, matching
    F.cross_entropy(reduction='mean', ignore_index=ignore_id).
    """
    N, C, H, W = logits.shape
    assert labels.shape == (N, H, W)
    assert C == num_classes
    # TODO(synk): the `upsample(y, t.shape[1:3])` branch (logit spatial size !=
    # label spatial size) of the original module is not implemented.

    HW = H * W
    T = min(max_tpix, _round_up(HW, 128))
    nb = pl.cdiv(HW, T)                       # number of real pixel blocks
    PO = 2 if nb >= 2 else 1                  # 2-way pixel split for 2-TC chips
    HW_pad = _round_up(HW, PO * T)
    inner = HW_pad // (PO * T)                # reduction steps per (n, po)

    # Free reshapes only: NCHW is already pixel-contiguous per class row.
    x = logits.reshape(N, C, HW)
    # Narrow labels to int8 (values in [0, 19]) to shave HBM bytes.
    t = labels.reshape(N, 1, HW).astype(jnp.int8)
    if HW_pad != HW:
        # Pad only the (tiny) label array with ignore_id; any garbage read in
        # the logits' ragged / clamped tail blocks is masked by those labels.
        t = jnp.pad(t, ((0, 0), (0, 0), (0, HW_pad - HW)),
                    constant_values=ignore_id)

    grid = (N, PO, inner)
    kernel = functools.partial(_ce_kernel, ignore_id=ignore_id)

    def logits_map(n, q, p):
        # Clamp so padded grid steps never start a block fully out of bounds.
        return (n, 0, jnp.minimum(q * inner + p, nb - 1))

    def labels_map(n, q, p):
        return (n, 0, q * inner + p)          # labels are padded: always valid

    sums, cnts = pl.pallas_call(
        kernel,
        out_shape=(
            jax.ShapeDtypeStruct((N, PO, 1, T), jnp.float32),
            jax.ShapeDtypeStruct((N, PO, 1, T), jnp.float32),
        ),
        grid_spec=pltpu.PrefetchScalarGridSpec(
            num_scalar_prefetch=0,
            grid=grid,
            in_specs=[
                pl.BlockSpec((1, C, T), logits_map),
                pl.BlockSpec((1, 1, T), labels_map),
            ],
            out_specs=(
                pl.BlockSpec((1, 1, 1, T), lambda n, q, p: (n, q, 0, 0)),
                pl.BlockSpec((1, 1, 1, T), lambda n, q, p: (n, q, 0, 0)),
            ),
        ),
        compiler_params=pltpu.CompilerParams(
            # Batch and pixel-outer axes are parallel (megacore on v7x even
            # for N=1); the inner pixel axis is the resident-accumulator
            # reduction, so it is last and arbitrary.
            dimension_semantics=("parallel", "parallel", "arbitrary"),
            vmem_limit_bytes=VMEM_LIMIT_BYTES,
        ),
    )(x, t)

    # Final cross-lane reduce + mean over non-ignored pixels.  If every pixel
    # is ignored this yields NaN, same as PyTorch.  Labels outside
    # [0, num_classes-1] that are not ignore_id contribute lse (PyTorch raises).
    return jnp.sum(sums) / jnp.sum(cnts)


def _reference_loss(logits, labels, ignore_id=IGNORE_ID):
    # Pure-JAX reference mirroring F.cross_entropy with ignore_index.
    N, C, H, W = logits.shape
    x = jnp.transpose(logits, (0, 2, 3, 1)).reshape(-1, C).astype(jnp.float32)
    t = labels.reshape(-1).astype(jnp.int32)
    logp = jax.nn.log_softmax(x, axis=-1)
    safe_t = jnp.where(t == ignore_id, 0, t)
    nll = -jnp.take_along_axis(logp, safe_t[:, None], axis=-1)[:, 0]
    valid = (t != ignore_id).astype(jnp.float32)
    return jnp.sum(nll * valid) / jnp.sum(valid)


if __name__ == "__main__":
    key = jax.random.PRNGKey(0)
    k1, k2, k3, k4 = jax.random.split(key, 4)

    # Test 1: small aligned shapes, f32 logits.
    N, C, H, W = 2, NUM_CLASSES, 16, 16
    logits = jax.random.normal(k1, (N, C, H, W), dtype=jnp.float32)
    # labels in [0, num_classes]; value == num_classes (19) is the ignore id
    labels = jax.random.randint(k2, (N, H, W), 0, NUM_CLASSES + 1,
                                dtype=jnp.int32)
    loss = jax.block_until_ready(semseg_cross_entropy(logits, labels))
    ref = jax.block_until_ready(_reference_loss(logits, labels))
    assert jnp.allclose(loss, ref, rtol=1e-5, atol=1e-5), (loss, ref)

    # Test 2: ragged spatial size with a tiny tile override — exercises label
    # padding, the clamped logits index_map and the 2-way pixel-outer split.
    H2, W2 = 15, 20                                  # HW=300, T=128 -> 3 blocks
    logits2 = jax.random.normal(k3, (1, C, H2, W2), dtype=jnp.float32)
    labels2 = jax.random.randint(k4, (1, H2, W2), 0, NUM_CLASSES + 1,
                                 dtype=jnp.int32)
    loss2 = jax.block_until_ready(
        semseg_cross_entropy(logits2, labels2, max_tpix=128))
    ref2 = jax.block_until_ready(_reference_loss(logits2, labels2))
    assert jnp.allclose(loss2, ref2, rtol=1e-5, atol=1e-5), (loss2, ref2)

    # Test 3: bf16 logits (half the HBM bytes); the kernel upcasts internally.
    logits_bf16 = logits.astype(jnp.bfloat16)
    loss3 = jax.block_until_ready(semseg_cross_entropy(logits_bf16, labels))
    ref3 = jax.block_until_ready(
        _reference_loss(logits_bf16.astype(jnp.float32), labels))
    assert jnp.allclose(loss3, ref3, rtol=1e-4, atol=1e-4), (loss3, ref3)

    print("KERNEL_OK")
</pallas_src>

<mosaic_0001>
module attributes {stable_mosaic.version = 11 : i64} {
  func.func @_ce_kernel(%arg0: i32, %arg1: i32, %arg2: i32, %arg3: memref<1x19x256xf32, #tpu.memory_space<vmem>>, %arg4: memref<1x1x256xi8, #tpu.memory_space<vmem>>, %arg5: memref<1x1x1x256xf32, #tpu.memory_space<vmem>>, %arg6: memref<1x1x1x256xf32, #tpu.memory_space<vmem>>) attributes {dimension_semantics = [#tpu.dimension_semantics<parallel>, #tpu.dimension_semantics<parallel>, #tpu.dimension_semantics<arbitrary>], iteration_bounds = array<i64: 2, 1, 1>, scalar_prefetch = 0 : i64, scratch_operands = 0 : i64, tpu.core_type = #tpu.core_type<tc>, window_params = [{transform_indices = @transform_0, window_bounds = array<i64: 1, 19, 256>}, {transform_indices = @transform_1, window_bounds = array<i64: 1, 1, 256>}, {transform_indices = @transform_2, window_bounds = array<i64: 1, 1, 1, 256>}, {transform_indices = @transform_3, window_bounds = array<i64: 1, 1, 1, 256>}]} {
    %c0_i32 = arith.constant 0 : i32
    %0 = arith.cmpi eq, %arg2, %c0_i32 : i32
    %1 = arith.extui %0 : i1 to i32
    %c0_i32_0 = arith.constant 0 : i32
    %2 = arith.cmpi ne, %1, %c0_i32_0 : i32
    scf.if %2 {
      %cst_26 = arith.constant 0.000000e+00 : f32
      %38 = vector.broadcast %cst_26 : f32 to vector<1x1x1x256xf32>
      %c0_27 = arith.constant 0 : index
      %c0_28 = arith.constant 0 : index
      %c0_29 = arith.constant 0 : index
      %c0_30 = arith.constant 0 : index
      %39 = vector.load %arg5[%c0_27, %c0_28, %c0_29, %c0_30] : memref<1x1x1x256xf32, #tpu.memory_space<vmem>>, vector<1x1x1x256xf32>
      tpu.vector_store %arg5[%c0_27, %c0_28, %c0_29, %c0_30], %38 {strides = array<i32>} : memref<1x1x1x256xf32, #tpu.memory_space<vmem>>, vector<1x1x1x256xf32>,
      %cst_31 = arith.constant 0.000000e+00 : f32
      %40 = vector.broadcast %cst_31 : f32 to vector<1x1x1x256xf32>
      %c0_32 = arith.constant 0 : index
      %c0_33 = arith.constant 0 : index
      %c0_34 = arith.constant 0 : index
      %c0_35 = arith.constant 0 : index
      %41 = vector.load %arg6[%c0_32, %c0_33, %c0_34, %c0_35] : memref<1x1x1x256xf32, #tpu.memory_space<vmem>>, vector<1x1x1x256xf32>
      tpu.vector_store %arg6[%c0_32, %c0_33, %c0_34, %c0_35], %40 {strides = array<i32>} : memref<1x1x1x256xf32, #tpu.memory_space<vmem>>, vector<1x1x1x256xf32>,
    } else {
    }
    %c0 = arith.constant 0 : index
    %c0_1 = arith.constant 0 : index
    %c0_2 = arith.constant 0 : index
    %3 = vector.load %arg3[%c0, %c0_1, %c0_2] : memref<1x19x256xf32, #tpu.memory_space<vmem>>, vector<1x19x256xf32>
    %4 = vector.shape_cast %3 : vector<1x19x256xf32> to vector<19x256xf32>
    %c0_3 = arith.constant 0 : index
    %c0_4 = arith.constant 0 : index
    %c0_5 = arith.constant 0 : index
    %5 = vector.load %arg4[%c0_3, %c0_4, %c0_5] : memref<1x1x256xi8, #tpu.memory_space<vmem>>, vector<1x1x256xi8>
    %6 = vector.shape_cast %5 : vector<1x1x256xi8> to vector<1x256xi8>
    %7 = arith.extsi %6 : vector<1x256xi8> to vector<1x256xi32>
    %cst = arith.constant dense<0xFF800000> : vector<256xf32>
    %8 = vector.multi_reduction <maximumf>, %4, %cst [0] : vector<19x256xf32> to vector<256xf32>
    %9 = vector.shape_cast %8 : vector<256xf32> to vector<1x256xf32>
    %10 = vector.broadcast %9 : vector<1x256xf32> to vector<19x256xf32>
    %11 = arith.subf %4, %10 : vector<19x256xf32>
    %12 = math.exp %11 : vector<19x256xf32>
    %cst_6 = arith.constant dense<0.000000e+00> : vector<256xf32>
    %13 = vector.multi_reduction <add>, %12, %cst_6 [0] : vector<19x256xf32> to vector<256xf32>
    %14 = vector.shape_cast %13 : vector<256xf32> to vector<1x256xf32>
    %15 = math.log %14 : vector<1x256xf32>
    %16 = tpu.iota {dimensions = array<i32: 0>} : vector<19x256xi32>
    %17 = vector.broadcast %7 : vector<1x256xi32> to vector<19x256xi32>
    %18 = arith.cmpi eq, %16, %17 : vector<19x256xi32>
    %cst_7 = arith.constant 0.000000e+00 : f32
    %19 = vector.broadcast %cst_7 : f32 to vector<19x256xf32>
    %20 = arith.select %18, %11, %19 : vector<19x256xi1>, vector<19x256xf32>
    %cst_8 = arith.constant dense<0.000000e+00> : vector<256xf32>
    %21 = vector.multi_reduction <add>, %20, %cst_8 [0] : vector<19x256xf32> to vector<256xf32>
    %22 = vector.shape_cast %21 : vector<256xf32> to vector<1x256xf32>
    %c19_i32 = arith.constant 19 : i32
    %23 = vector.broadcast %c19_i32 : i32 to vector<1x256xi32>
    %24 = arith.cmpi ne, %7, %23 : vector<1x256xi32>
    %25 = arith.subf %15, %22 : vector<1x256xf32>
    %cst_9 = arith.constant 0.000000e+00 : f32
    %26 = vector.broadcast %cst_9 : f32 to vector<1x256xf32>
    %27 = arith.select %24, %25, %26 : vector<1x256xi1>, vector<1x256xf32>
    %c0_10 = arith.constant 0 : index
    %c0_11 = arith.constant 0 : index
    %c0_12 = arith.constant 0 : index
    %c0_13 = arith.constant 0 : index
    %28 = vector.load %arg5[%c0_10, %c0_11, %c0_12, %c0_13] : memref<1x1x1x256xf32, #tpu.memory_space<vmem>>, vector<1x1x1x256xf32>
    %29 = vector.shape_cast %27 : vector<1x256xf32> to vector<1x1x1x256xf32>
    %30 = arith.addf %28, %29 : vector<1x1x1x256xf32>
    %c0_14 = arith.constant 0 : index
    %c0_15 = arith.constant 0 : index
    %c0_16 = arith.constant 0 : index
    %c0_17 = arith.constant 0 : index
    %31 = vector.load %arg5[%c0_14, %c0_15, %c0_16, %c0_17] : memref<1x1x1x256xf32, #tpu.memory_space<vmem>>, vector<1x1x1x256xf32>
    tpu.vector_store %arg5[%c0_14, %c0_15, %c0_16, %c0_17], %30 {strides = array<i32>} : memref<1x1x1x256xf32, #tpu.memory_space<vmem>>, vector<1x1x1x256xf32>,
    %c0_18 = arith.constant 0 : index
    %c0_19 = arith.constant 0 : index
    %c0_20 = arith.constant 0 : index
    %c0_21 = arith.constant 0 : index
    %32 = vector.load %arg6[%c0_18, %c0_19, %c0_20, %c0_21] : memref<1x1x1x256xf32, #tpu.memory_space<vmem>>, vector<1x1x1x256xf32>
    %33 = arith.extui %24 : vector<1x256xi1> to vector<1x256xi32>
    %34 = arith.sitofp %33 : vector<1x256xi32> to vector<1x256xf32>
    %35 = vector.shape_cast %34 : vector<1x256xf32> to vector<1x1x1x256xf32>
    %36 = arith.addf %32, %35 : vector<1x1x1x256xf32>
    %c0_22 = arith.constant 0 : index
    %c0_23 = arith.constant 0 : index
    %c0_24 = arith.constant 0 : index
    %c0_25 = arith.constant 0 : index
    %37 = vector.load %arg6[%c0_22, %c0_23, %c0_24, %c0_25] : memref<1x1x1x256xf32, #tpu.memory_space<vmem>>, vector<1x1x1x256xf32>
    tpu.vector_store %arg6[%c0_22, %c0_23, %c0_24, %c0_25], %36 {strides = array<i32>} : memref<1x1x1x256xf32, #tpu.memory_space<vmem>>, vector<1x1x1x256xf32>,
    return
  }
  func.func @transform_0(%arg0: i32, %arg1: i32, %arg2: i32) -> (i32, i32, i32) {
    %c1_i32 = arith.constant 1 : i32
    %0 = arith.muli %arg1, %c1_i32 : i32
    %1 = arith.addi %0, %arg2 : i32
    %c0_i32 = arith.constant 0 : i32
    %2 = arith.minsi %1, %c0_i32 : i32
    %c0_i32_0 = arith.constant 0 : i32
    %c0_i32_1 = arith.constant 0 : i32
    return %arg0, %c0_i32_0, %2 : i32, i32, i32
  }
  func.func @transform_1(%arg0: i32, %arg1: i32, %arg2: i32) -> (i32, i32, i32) {
    %c1_i32 = arith.constant 1 : i32
    %0 = arith.muli %arg1, %c1_i32 : i32
    %1 = arith.addi %0, %arg2 : i32
    %c0_i32 = arith.constant 0 : i32
    %c0_i32_0 = arith.constant 0 : i32
    return %arg0, %c0_i32, %1 : i32, i32, i32
  }
  func.func @transform_2(%arg0: i32, %arg1: i32, %arg2: i32) -> (i32, i32, i32, i32) {
    %c0_i32 = arith.constant 0 : i32
    %c0_i32_0 = arith.constant 0 : i32
    %c0_i32_1 = arith.constant 0 : i32
    return %arg0, %arg1, %c0_i32, %c0_i32_0 : i32, i32, i32, i32
  }
  func.func @transform_3(%arg0: i32, %arg1: i32, %arg2: i32) -> (i32, i32, i32, i32) {
    %c0_i32 = arith.constant 0 : i32
    %c0_i32_0 = arith.constant 0 : i32
    %c0_i32_1 = arith.constant 0 : i32
    return %arg0, %arg1, %c0_i32, %c0_i32_0 : i32, i32, i32, i32
  }
}

</mosaic_0001>

<bundles_post_ra>
// kernel: tpu_custom_call.1
= control target key start
LH: loop header
LB: loop body
LE: loop exit
PB: predicated region body
PF: predicated region fallthrough
CT: control target
= control target key end

     0   :  { %9 = vsyncpa [#allocation3], 0  ;;  %s1057_s0 = inlined_call_operand.vmem [shape: f32[2,19,256], index: 0, kind: input, shape index: {}]   ;;  %s1058_s1 = inlined_call_operand.vmem [shape: s8[2,1,256], index: 1, kind: input, shape index: {}]   ;;  %s1059_s2 = inlined_call_operand.hbm [shape: f32[2,1,1,256], index: 2, kind: output, shape index: {0}]   ;;  %s1060_s3 = inlined_call_operand.hbm [shape: f32[2,1,1,256], index: 3, kind: output, shape index: {1}]  }
   0x1   :  { %11 = vsyncpa [#allocation3 + $0x1], 0 }
   0x2   :  { %12 = vsyncpa [#allocation5], 0 }
   0x3   :  { %14 = vsyncpa [#allocation5 + $0x1], 0  ;;  %s857_s12 = smov 0   ;;  %s859_s13 = smov 0  }
   0x4   :  { %s861_s14 = smov 0   ;;  %s863_s15 = smov 0  }
   0x5   :  { %s865_s16 = smov 0   ;;  %s867_s17 = smov 0  }
   0x6 LB: > { %s626_s18 = sadd.s32 4294967295, %s831_s17   ;;  %s627_s19 = sadd.s32 4294967294, %s831_s17   ;;  %s831_s17 = sphi %s867_s17, %s20_s17   ;;  %s827_s16 = sphi %s865_s16, %s1069_s16   ;;  %s823_s15 = sphi %s863_s15, %s1068_s15   ;;  %s819_s14 = sphi %s861_s14, %s1067_s14   ;;  %s815_s13 = sphi %s859_s13, %s1066_s13   ;;  %s811_s12 = sphi %s857_s12, %s1065_s12  }
   0x7   : > { %s39_s20 = sadd.s32 1, %s827_s16  ;;  %s112_s21 = sadd.s32 1, %s819_s14 }
   0x8   : > { %p41_p0 = scmp.ge.s32.totalorder %s39_s20, 2  ;;  %p122_p1 = scmp.ne.s32.totalorder %s819_s14, %s815_s13 }
   0x9   : > { %p123_p2 = scmp.eq.s32.totalorder %s626_s18, 1  ;;  %p128_p3 = scmp.ne.s32.totalorder %s815_s13, %s811_s12 }
   0xa   : > { %s1071_s20 = smov (%p41_p0, %s39_s20), 0  ;;  %p129_p5 = scmp.eq.s32.totalorder %s627_s19, 1 }
   0xb   : > { %p897_p4 = por %p123_p2, %p122_p1  ;;  %s107_s23 = ssub.s32 %s827_s16, %s1071_s20 }
   0xc   : > { %p630_p6 = scmp.ge.s32.totalorder %s831_s17, 1  ;;  %p110_p7 = scmp.eq.s32.totalorder %s107_s23, 0 }
   0xd   : > { %p904_p8 = por %p129_p5, %p128_p3  ;;  %p208_p9 = scmp.lt.s32.totalorder %s831_s17, 3 }
   0xe   : > { %s910_s25 = scalar_select %p110_p7, %s819_s14, %s112_s21  }
   0xf   : > { %p209_p10 = pnand %p630_p6, %p208_p9 }
  0x10   : > { %s913_s26 = sand.u32 (!%p209_p10), 1, %s815_s13   ;;  %p257_p11 = scmp.lt.s32.totalorder (!%p209_p10), %s823_s15, 1 }
  0x11   : > { %212 = sbr.rel (%p209_p10) target bundleno = 134 (0x86), region = 28  ;;  %s631_s27 = sshll.u32 (!%p209_p10), %s913_s26, 1 }
  0x12   : > { %s922_s29 = scalar_lea.vmem (!%p209_p10), [#allocation2], %s631_s27  ;;  %s927_s30 = scalar_lea.vmem (!%p209_p10), [#allocation4], %s631_s27 }
  0x13   : > { %s644_s18 = sshll.u32 (!%p209_p10), %s823_s15, 5  ;;  %s497_s19 = sshll.u32 (!%p209_p10), %s927_s30, 4  ;;  %s968_s19 = int_to_ptr.vmem [resolvable:$true] %s497_s19 }
  0x14   : > { %s966_s27 = scalar_lea.hbm (!%p209_p10), %s1060_s3, %s644_s18 }
  0x16   : > { %v284_v0 = vlaneseq  ;;  %v833_v1 = vmov 1966171168   ;;  %s258_s28 = scalar_select %p257_p11, %s823_s15, 1  ;;  %v834_v4 = vmov 0.0   ;;  %vm298_vm1 = vcmask 1042432  }
  0x17   : > { %v418_v2 = vunpack.c.l.s4 %v833_v1 }
  0x18   : > { %vm917_vm0 = vcmp.lt.s32.totalorder %v284_v0, 256  ;;  %s646_s4 = smul.u32 48, %s258_s28  ;;  %s634_s5 = sshll.u32 %s258_s28, 1  ;;  %v938_v7 = vshrl.u32 %v284_v0, 7 }
  0x19   : > { %288 = vst.msk [vmem:[%s922_s29] sm:$0x3] %vm917_vm0, %v834_v4  ;;  %289 = vst.msk [vmem:[%s927_s30] sm:$0x3] %vm917_vm0, %v834_v4  ;;  %v419_v5 = vunpack.c.0.s8 %v418_v2  ;;  %s277_s8 = scalar_lea.vmem %s1058_s1, %s634_s5  ;;  %s465_s28 = scalar_lea.sflag [#allocation5], %s913_s26 }
  0x1a   : > { %s264_s11 = scalar_lea.vmem %s1057_s0, %s646_s4  ;;  %v296_v6 = vld [vmem:[%s277_s8] sm:$0x3]  ;;  %s725_s4 = scalar_lea.vmem %s968_s19, 32 }
  0x1b   : > { %v290_v8 = vld [vmem:[%s264_s11] sm:$0xff]  ;;  %v291_v9 = vld [vmem:[%s264_s11 + $0x8] sm:$0xff]  ;;  %v944_v12 = vunpack.c.0.s8 %v296_v6  ;;  %v947_v13 = vsub.s32 %v419_v5, %v938_v7  ;;  %v292_v14 = vld [vmem:[%s264_s11 + $0x10] sm:$0xff]  ;;  %p726_p12 = scmp.ne.s32.totalorder %s968_s19, %s725_s4  ;;  %s835_s5 = smov [#allocation4]  }
  0x1c   : > { %v940_v10 = vld [vmem:[%s264_s11 + $0x20] sm:$0x7]  ;;  %v942_v11 = vld [vmem:[%s264_s11 + $0x28] sm:$0x7]  ;;  %v293_v15 = vld [vmem:[%s264_s11 + $0x18] sm:$0xff]  ;;  %s729_s6 = sshll.u32 %s835_s5, 4  ;;  %s730_s6 = int_to_ptr.vmem [resolvable:$false] %s729_s6 }
  0x1d   : > { %v299_v16 = vsel %vm298_vm1, %v940_v10, -inf  ;;  %v308_v17 = vsel %vm298_vm1, %v942_v11, -inf  ;;  %vm407_vm2 = vcmp.ne.s32.totalorder %v944_v12, 19  ;;  %p727_p13 = pnand %p726_p12, %p897_p4  ;;  %s731_s7 = scalar_lea.vmem %s730_s6, 64 }
  0x1e   : > { %v300_v18 = vmax.f32 %v290_v8, %v299_v16  ;;  %v309_v19 = vmax.f32 %v291_v9, %v308_v17  ;;  %v635_v20 = vsel %vm407_vm2, 1.0, %v834_v4  ;;  %p732_p1 = scmp.lt.s32.totalorder %s968_s19, %s730_s6  ;;  %p733_p2 = scmp.lt.s32.totalorder %s731_s7, %s725_s4 }
  0x1f   : > { %v448_v23 = vrot.slane %v635_v20, %v947_v13  ;;  %p728_p0 = pneg %p727_p13 }
  0x20   : > { %v301_v21 = vmax.f32 %v300_v18, %v292_v14  ;;  %v310_v22 = vmax.f32 %v309_v19, %v293_v15  ;;  %v438_v26 = vld [vmem:[%s927_s30] sm:$0x3]  ;;  %p734_p3 = por %p733_p2, %p732_p1 }
  0x21   : > { %v455_v27 = vrot.slane %v448_v23, %v947_v13 }
  0x22   : > { %v302_v24 = vrot.slane %v301_v21, 4  ;;  %v311_v25 = vrot.slane %v310_v22, 4  ;;  %p735_p5 = pnand %p734_p3, %p728_p0 }
  0x23   : > { %v457_v30 = vadd.f32 %v455_v27, %v438_v26 }
  0x24   : > { %v303_v28 = vmax.f32 %v301_v21, %v302_v24  ;;  %v312_v29 = vmax.f32 %v310_v22, %v311_v25 }
  0x25   : > { %458 = vst.msk [vmem:[%s927_s30] sm:$0x3] %vm917_vm0, %v457_v30 }
  0x26   : > { %v304_v31 = vrot.slane %v303_v28, 2  ;;  %v313_v32 = vrot.slane %v312_v29, 2 }
  0x28   : > { %v305_v33 = vmax.f32 %v303_v28, %v304_v31  ;;  %v314_v34 = vmax.f32 %v312_v29, %v313_v32 }
  0x29   : > { %738 = shalt.err (!%p735_p5)
}
  0x2a   : > { %s739_s30 = scalar_lea.hbm %s966_s27, 32  ;;  %s743_s10 = scalar_lea.hbm %s1060_s3, 64 }
  0x2b   : > { %p740_p6 = scmp.ne.s32.totalorder %s966_s27, %s739_s30  ;;  %p744_p10 = scmp.lt.s32.totalorder %s966_s27, %s1060_s3 }
  0x2c   : > { %p745_p11 = scmp.lt.s32.totalorder %s743_s10, %s739_s30 }
  0x2d   : > { %p741_p7 = pnand %p740_p6, %p897_p4 }
  0x2e   : > { %p746_p12 = por %p745_p11, %p744_p10 }
  0x2f   : > { %p742_p9 = pneg %p741_p7 }
  0x31   : > { %p747_p13 = pnand %p746_p12, %p742_p9 }
  0x33   : > { %750 = shalt.err (!%p747_p13)
}
  0x34   : > { %648 = dma.vmem_to_hbm [thread:$0]  (%p897_p4), %s968_s19, 32, %s966_s27, %s465_s28   ;;  %v306_v35 = vrot.slane %v305_v33, 1  ;;  %v315_v36 = vrot.slane %v314_v34, 1  ;;  %v363_v49 = vsub.s32 0, %v938_v7  ;;  %v367_v51 = vsub.s32 4, %v938_v7 }
  0x35   : > { %v359_v55 = vadd.s32 8, %v938_v7  ;;  %v360_v57 = vadd.s32 16, %v938_v7  ;;  %s481_s19 = sshll.u32 %s922_s29, 4  ;;  %s479_s28 = scalar_lea.hbm %s1059_s2, %s644_s18  ;;  %s482_s19 = int_to_ptr.vmem [resolvable:$true] %s481_s19 }
  0x36   : > { %v307_v37 = vmax.f32 %v305_v33, %v306_v35  ;;  %v316_v38 = vmax.f32 %v314_v34, %v315_v36  ;;  %v364_v53 = vrot.slane %v944_v12, %v363_v49  ;;  %v368_v54 = vrot.slane %v944_v12, %v367_v51  ;;  %s460_s4 = scalar_lea.sflag [#allocation3], %s913_s26  ;;  %s751_s5 = scalar_lea.vmem %s482_s19, 32 }
  0x37   : > { %p752_p0 = scmp.ne.s32.totalorder %s482_s19, %s751_s5  ;;  %s836_s6 = smov [#allocation2]  }
  0x38   : > { %v317_v39 = vsub.f32 %v290_v8, %v307_v37  ;;  %v318_v40 = vsub.f32 %v291_v9, %v316_v38  ;;  %v319_v41 = vsub.f32 %v292_v14, %v307_v37  ;;  %v320_v42 = vsub.f32 %v293_v15, %v316_v38  ;;  %s755_s7 = sshll.u32 %s836_s6, 4  ;;  %s756_s7 = int_to_ptr.vmem [resolvable:$false] %s755_s7 }
  0x39   : > { %v321_v43 = vsub.f32 %v940_v10, %v307_v37  ;;  %v322_v44 = vsub.f32 %v942_v11, %v316_v38  ;;  %v372_v56 = vrot.slane %v364_v53, %v363_v49  ;;  %v376_v58 = vrot.slane %v368_v54, %v363_v49  ;;  %p753_p1 = pnand %p752_p0, %p897_p4  ;;  %s757_s30 = scalar_lea.vmem %s756_s7, 64 }
  0x3a   : > { %v323_v45 = vmul.f32 1.442695, %v317_v39  ;;  %v325_v46 = vmul.f32 1.442695, %v318_v40  ;;  %v327_v47 = vmul.f32 1.442695, %v319_v41  ;;  %p758_p3 = scmp.lt.s32.totalorder %s482_s19, %s756_s7  ;;  %p759_p5 = scmp.lt.s32.totalorder %s757_s30, %s751_s5 }
  0x3b   : > { %v329_v48 = vmul.f32 1.442695, %v320_v42  ;;  %v331_v50 = vmul.f32 1.442695, %v321_v43  ;;  %v333_v52 = vmul.f32 1.442695, %v322_v44  ;;  %vm377_vm3 = vcmp.eq.s32.totalorder %v938_v7, %v372_v56  ;;  %p754_p2 = pneg %p753_p1 }
  0x3c   : > { %709 = vpow2.f32 %v323_v45  ;;  %vm379_vm4 = vcmp.eq.s32.totalorder %v359_v55, %v372_v56  ;;  %vm378_vm5 = vcmp.eq.s32.totalorder %v938_v7, %v376_v58  ;;  %vm380_vm6 = vcmp.eq.s32.totalorder %v359_v55, %v376_v58  ;;  %v415_v55 = vld [vmem:[%s922_s29] sm:$0x3]  ;;  %p760_p6 = por %p759_p5, %p758_p3 }
  0x3d   : > { %711 = vpow2.f32 %v325_v46  ;;  %vm381_vm7 = vcmp.eq.s32.totalorder %v360_v57, %v372_v56  ;;  %vm382_vm8 = vcmp.eq.s32.totalorder %v360_v57, %v376_v58  ;;  %v383_v61 = vsel %vm377_vm3, %v317_v39, 0.0 }
  0x3e   : > { %713 = vpow2.f32 %v327_v47  ;;  %v385_v62 = vsel %vm379_vm4, %v319_v41, 0.0  ;;  %v384_v0 = vsel %vm378_vm5, %v318_v40, 0.0  ;;  %v386_v1 = vsel %vm380_vm6, %v320_v42, 0.0  ;;  %p761_p7 = pnand %p760_p6, %p754_p2 }
  0x3f   : > { %715 = vpow2.f32 %v329_v48  ;;  %v387_v2 = vsel %vm381_vm7, %v321_v43, 0.0  ;;  %v388_v6 = vsel %vm382_vm8, %v322_v44, 0.0  ;;  %v389_v10 = vadd.f32 %v385_v62, %v383_v61 }
  0x40   : > { %717 = vpow2.f32 %v331_v50  ;;  %v390_v14 = vsel %vm298_vm1, %v387_v2, 0.0  ;;  %v398_v15 = vadd.f32 %v386_v1, %v384_v0  ;;  %v399_v18 = vsel %vm298_vm1, %v388_v6, 0.0 }
  0x41   : > { %719 = vpow2.f32 %v333_v52  ;;  %v391_v21 = vadd.f32 %v390_v14, %v389_v10 }
  0x42   : > { %v400_v23 = vadd.f32 %v399_v18, %v398_v15 }
  0x43   : > { %v392_v27 = vrot.slane %v391_v21, 4 }
  0x44   : > { %v401_v29 = vrot.slane %v400_v23, 4 }
  0x45   : > { %v393_v33 = vadd.f32 %v392_v27, %v391_v21 }
  0x46   : > { %v402_v35 = vadd.f32 %v401_v29, %v400_v23 }
  0x47   : > { %v394_v38 = vrot.slane %v393_v33, 2 }
  0x48   : > { %v403_v39 = vrot.slane %v402_v35, 2 }
  0x49   : > { %v710_v59 = vpop.eup %709  ;;  %v395_v40 = vadd.f32 %v394_v38, %v393_v33 }
  0x4a   : > { %v712_v60 = vpop.eup %711  ;;  %v404_v41 = vadd.f32 %v403_v39, %v402_v35 }
  0x4b   : > { %v714_v63 = vpop.eup %713  ;;  %v396_v42 = vrot.slane %v395_v40, 1 }
  0x4c   : > { %v716_v4 = vpop.eup %715  ;;  %v335_v5 = vadd.f32 %v714_v63, %v710_v59  ;;  %v405_v43 = vrot.slane %v404_v41, 1 }
  0x4d   : > { %v718_v8 = vpop.eup %717  ;;  %v344_v9 = vadd.f32 %v716_v4, %v712_v60  ;;  %v397_v44 = vadd.f32 %v396_v42, %v395_v40 }
  0x4e   : > { %v720_v11 = vpop.eup %719  ;;  %v336_v7 = vsel %vm298_vm1, %v718_v8, 0.0  ;;  %v406_v46 = vadd.f32 %v405_v43, %v404_v41 }
  0x4f   : > { %v337_v16 = vadd.f32 %v336_v7, %v335_v5  ;;  %v345_v17 = vsel %vm298_vm1, %v720_v11, 0.0 }
  0x50   : > { %v346_v19 = vadd.f32 %v345_v17, %v344_v9 }
  0x51   : > { %v338_v20 = vrot.slane %v337_v16, 4 }
  0x52   : > { %v347_v22 = vrot.slane %v346_v19, 4 }
  0x53   : > { %v339_v24 = vadd.f32 %v338_v20, %v337_v16 }
  0x54   : > { %v348_v25 = vadd.f32 %v347_v22, %v346_v19 }
  0x55   : > { %v340_v26 = vrot.slane %v339_v24, 2 }
  0x56   : > { %v349_v28 = vrot.slane %v348_v25, 2 }
  0x57   : > { %v341_v30 = vadd.f32 %v340_v26, %v339_v24 }
  0x58   : > { %v350_v31 = vadd.f32 %v349_v28, %v348_v25 }
  0x59   : > { %v342_v32 = vrot.slane %v341_v30, 1 }
  0x5a   : > { %v351_v34 = vrot.slane %v350_v31, 1 }
  0x5b   : > { %v343_v36 = vadd.f32 %v342_v32, %v341_v30 }
  0x5c   : > { %v352_v37 = vadd.f32 %v351_v34, %v350_v31 }
  0x5d   : > { %721 = vlog2.f32 %v343_v36 }
  0x5e   : > { %723 = vlog2.f32 %v352_v37 }
  0x6a   : > { %v722_v45 = vpop.eup %721 }
  0x6b   : > { %v724_v47 = vpop.eup %723  ;;  %v354_v48 = vmul.f32 0.6931472, %v722_v45 }
  0x6c   : > { %v356_v49 = vmul.f32 0.6931472, %v724_v47 }
  0x6d   : > { %v408_v50 = vsub.f32 %v354_v48, %v397_v44 }
  0x6e   : > { %v409_v51 = vsub.f32 %v356_v49, %v406_v46 }
  0x70   : > { %v412_v52 = vcombine.low %v408_v50, %v409_v51 }
  0x72   : > { %v414_v53 = vsel %vm407_vm2, %v412_v52, 0.0 }
  0x73   : > { %v423_v54 = vrot.slane %v414_v53, %v947_v13 }
  0x75   : > { %v430_v56 = vrot.slane %v423_v54, %v947_v13 }
  0x77   : > { %v432_v57 = vadd.f32 %v430_v56, %v415_v55 }
  0x79   : > { %437 = vst.msk [vmem:[%s922_s29] sm:$0x3] %vm917_vm0, %v432_v57 }
  0x7a   : > { %764 = shalt.err (!%p761_p7)
}
  0x7b   : > { %s765_s15 = scalar_lea.hbm %s479_s28, 32  ;;  %s769_s18 = scalar_lea.hbm %s1059_s2, 64 }
  0x7c   : > { %p766_p9 = scmp.ne.s32.totalorder %s479_s28, %s765_s15  ;;  %p770_p12 = scmp.lt.s32.totalorder %s479_s28, %s1059_s2 }
  0x7d   : > { %p771_p13 = scmp.lt.s32.totalorder %s769_s18, %s765_s15 }
  0x7e   : > { %p767_p10 = pnand %p766_p9, %p897_p4 }
  0x7f   : > { %p772_p0 = por %p771_p13, %p770_p12 }
  0x80   : > { %p768_p11 = pneg %p767_p10 }
  0x82   : > { %p773_p1 = pnand %p772_p0, %p768_p11 }
  0x84   : > { %776 = shalt.err (!%p773_p1)
}
  0x85   : > { %647 = dma.vmem_to_hbm [thread:$0]  (%p897_p4), %s482_s19, 32, %s479_s28, %s460_s4  }
  0x86 PF: > { %p658_p2 = scmp.ge.s32.totalorder %s831_s17, 2  ;;  %s509_s10 = sand.u32 1, %s811_s12  }
  0x87   : > { %s510_s11 = scalar_lea.sflag [#allocation3], %s509_s10 }
  0x88   : > { %p652_p3 = pnand %p658_p2, %p904_p8 }
  0x8a   : > { %p653_p5 = pneg %p652_p3 }
  0x8c   : > { %802 = dma.done.wait (%p653_p5), %s510_s11, 32  }
  0x8d   : > { %804 = vsyncadd (%p653_p5), %s510_s11, 4294967264  ;;  %s519_s21 = scalar_lea.sflag [#allocation5], %s509_s10 }
  0x8e   : > { %806 = dma.done.wait (%p653_p5), %s519_s21, 32  }
  0x8f   : > { %808 = vsyncadd (%p653_p5), %s519_s21, 4294967264  ;;  %s20_s17 = sadd.s32 1, %s831_s17   ;;  %s1065_s12 = smov %s815_s13 }
  0x90   : > { %p17_p6 = scmp.ge.s32.totalorder %s20_s17, 4   ;;  %s1066_s13 = smov %s819_s14 }
  0x91   : > { %s1067_s14 = smov %s910_s25  ;;  %s1068_s15 = smov %s827_s16 }
  0x92   : > { %s1069_s16 = smov %s1071_s20  ;;  %19 = sbr.rel (!%p17_p6) target bundleno = 6 (0x6), region = 87 }
  0x97   :  { %524 = vsyncpa [#allocation3], 1 }
  0x98   :  { %526 = vsyncpa [#allocation3 + $0x1], 1 }
  0x99   :  { %527 = vsyncpa [#allocation5], 1 }
  0x9a   :  { %529 = vsyncpa [#allocation5 + $0x1], 1 }

</bundles_post_ra>
